<compile_context>
chip_gen: v7x
topology: tpu7x:2x2x1
jax: 0.10.0
libtpu: 0.0.40
codegen_flags: <defaults>
</compile_context>

<pallas_src>
import numpy as np
import jax
import jax.numpy as jnp
from jax.experimental import pallas as pl
from jax.experimental.pallas import tpu as pltpu

MAX_TOKEN_LEN = 256
MAX_CLASSES = MAX_TOKEN_LEN // 2  # 128


# ----------------------------------------------------------------------------
# Host-side glue: deterministic "tokenizer" + token->class map construction
# (mirrors CaptionProcessor.get_token2prompt_map semantics).
# ----------------------------------------------------------------------------
def simple_tokenize_offsets(caption, max_len=MAX_TOKEN_LEN):
    """Whitespace tokenizer with character offset mapping (HF-style)."""
    # TODO(synk): the real module uses a HF tokenizer's offset_mapping; string
    # tokenization is host-side Python with no Pallas equivalent.
    offsets = [(0, 0)]  # [CLS]
    i, n = 0, len(caption)
    while i < n and len(offsets) < max_len - 1:
        while i < n and caption[i].isspace():
            i += 1
        if i >= n:
            break
        j = i
        while j < n and not caption[j].isspace():
            j += 1
        offsets.append((i, j))
        i = j
    offsets.append((0, 0))  # [SEP]
    return offsets


def get_token2prompt_map(caption, max_token_len=MAX_TOKEN_LEN,
                         max_classes=MAX_CLASSES):
    """Returns a [T, C] float32 numpy array mapping tokens -> prompt classes."""
    offsets = simple_tokenize_offsets(caption, max_token_len)
    cat_names = [c.strip() for c in caption.strip(' .').split('.') if c.strip()]
    class_token_map = np.zeros((max_classes, max_token_len), dtype=np.float32)
    curr_char_pos = 0
    for i, cat in enumerate(cat_names):
        try:
            cat_start = caption.index(cat, curr_char_pos)
        except ValueError:
            continue
        cat_end = cat_start + len(cat)
        for j, (start, end) in enumerate(offsets):
            if start is None or end is None:
                continue
            if end <= cat_start:
                continue
            if start >= cat_end:
                break
            class_token_map[i, j] = 1.0
        curr_char_pos = cat_end
    class_token_map = class_token_map / (
        class_token_map.sum(-1, keepdims=True) + 1e-06)
    return class_token_map.T  # [T, C]


def build_class_maps_and_bias(captions, T):
    """Stack per-caption maps + derive class-presence additive bias.

    Returns:
      maps_f32 : [B, T, C] float32 numpy
      col_bias : [B, 1, C] float32 numpy (0.0 for present classes, -inf else)
    """
    maps_f32 = np.stack([get_token2prompt_map(c)[:T] for c in captions], axis=0)
    present = maps_f32.sum(axis=1) > 0.0                              # [B, C]
    col_bias = np.where(present, 0.0, -np.inf).astype(np.float32)     # [B, C]
    return maps_f32, col_bias[:, None, :]                             # [B, 1, C]


# ----------------------------------------------------------------------------
# Pallas kernel: fused inf masking + (batched) matmul + class-presence bias.
# ----------------------------------------------------------------------------
def caption_processor_kernel(logits_ref, map_ref, bias_ref, out_ref):
    x = logits_ref[...]          # (Q, T)  or (bb, Q, T)   f32/bf16
    m = map_ref[...]             # (T, C)  or (bb, T, C)   f32
    bias = bias_ref[...]         # (1, C)  or (bb, 1, C)   f32

    # isinf computed once; reused for row mask and the -20 replacement.
    is_inf = jnp.isinf(x)
    row_mask = jnp.all(is_inf, axis=-1, keepdims=True)        # (..., Q, 1)
    x = jnp.where(is_inf, -20.0, x)                           # exact in bf16 too

    # Token-level -> class-level logits on the MXU, f32 operands / f32 accumulate
    # (maps stay f32 for parity with the f32 PyTorch module).
    xf = x.astype(jnp.float32)
    if xf.ndim == 2:
        y = jnp.dot(xf, m, preferred_element_type=jnp.float32)           # (Q, C)
    else:
        y = jnp.einsum('bqt,btc->bqc', xf, m,
                       preferred_element_type=jnp.float32)               # (bb, Q, C)

    # Host-provided class-presence bias: 0 for present classes, -inf otherwise.
    y = y + bias
    # Fully-inf query rows -> -inf everywhere.
    y = jnp.where(row_mask, -jnp.inf, y)

    out_ref[...] = y.astype(out_ref.dtype)


def _round_up(x, m):
    return (x + m - 1) // m * m


def _choose_batch_block(B, per_batch_bytes, budget_bytes):
    """Largest batch block whose step footprint fits the VMEM budget."""
    cap = max(1, min(B, budget_bytes // max(per_batch_bytes, 1)))
    if cap >= B:
        return B                     # everything fits -> single grid step
    if B >= 4:                       # multi-step: amortize pipeline prologue/
        cap = min(cap, max(1, B // 4))   # epilogue over >= 4 steps
    for d in range(cap, 0, -1):      # largest divisor of B <= cap
        if B % d == 0:
            return d
    return 1


def caption_processor_forward(logits, class_maps, col_bias):
    """logits: [B, Q, T] (f32 or bf16), class_maps: [B, T, C] f32,
    col_bias: [B, 1, C] f32  ->  class_logit [B, Q, C] f32."""
    B, Q, T = logits.shape
    _, _, C = class_maps.shape

    # ---- VMEM-budgeted batch-block selection (sublane/lane padded bytes) ----
    q_pad = _round_up(max(Q, 1), 8)
    t_pad = _round_up(T, 128)
    c_pad = _round_up(C, 128)
    lg_bytes = logits.dtype.itemsize
    mp_bytes = class_maps.dtype.itemsize
    per_batch_bytes = (q_pad * t_pad * lg_bytes       # logits block
                       + t_pad * c_pad * mp_bytes     # map block
                       + 8 * c_pad * 4                # bias block (1 -> 8 sublanes)
                       + q_pad * c_pad * 4)           # output block
    STEP_BUDGET = 8 << 20                             # ~8 MiB/step (~16 MiB dbl-buffered)
    bb = _choose_batch_block(B, per_batch_bytes, STEP_BUDGET)
    num_steps = B // bb

    # Scoped VMEM: cover double-buffered blocks + headroom; never below the
    # conservative 16 MiB (v5e default), never above 48 MiB (fits v7x 64 MiB).
    vmem_limit = int(min(48 << 20,
                         max(16 << 20, 2 * bb * per_batch_bytes + (2 << 20))))

    if bb == 1:
        # Squeeze the degenerate leading batch dim -> (Q,T)/(T,C)/(1,C)/(Q,C).
        in_specs = [
            pl.BlockSpec((None, Q, T), lambda i: (i, 0, 0)),
            pl.BlockSpec((None, T, C), lambda i: (i, 0, 0)),
            pl.BlockSpec((None, 1, C), lambda i: (i, 0, 0)),
        ]
        out_specs = pl.BlockSpec((None, Q, C), lambda i: (i, 0, 0))
    else:
        in_specs = [
            pl.BlockSpec((bb, Q, T), lambda i: (i, 0, 0)),
            pl.BlockSpec((bb, T, C), lambda i: (i, 0, 0)),
            pl.BlockSpec((bb, 1, C), lambda i: (i, 0, 0)),
        ]
        out_specs = pl.BlockSpec((bb, Q, C), lambda i: (i, 0, 0))

    cost = pl.CostEstimate(
        flops=2 * B * Q * T * C,
        transcendentals=0,
        bytes_accessed=(B * Q * T * lg_bytes + B * T * C * mp_bytes
                        + B * C * 4 + B * Q * C * 4),
    )

    dim_sem = ("arbitrary",) if num_steps == 1 else ("parallel",)

    return pl.pallas_call(
        caption_processor_kernel,
        out_shape=jax.ShapeDtypeStruct((B, Q, C), jnp.float32),
        grid=(num_steps,),
        in_specs=in_specs,
        out_specs=out_specs,
        compiler_params=pltpu.CompilerParams(
            dimension_semantics=dim_sem,
            vmem_limit_bytes=vmem_limit),
        cost_estimate=cost,
    )(logits, class_maps, col_bias)


# Pure-JAX full-precision reference (true module semantics) for verification.
def reference_forward(logits, class_maps_f32):
    logits = logits.astype(jnp.float32)
    is_inf = jnp.isinf(logits)
    row_mask = jnp.all(is_inf, axis=2)                            # (B, Q)
    x = jnp.where(is_inf, -20.0, logits)
    y = jnp.einsum('bqt,btc->bqc', x, class_maps_f32,
                   precision=jax.lax.Precision.HIGHEST)
    col_mask = jnp.sum(class_maps_f32, axis=1) == 0.0             # (B, C)
    y = jnp.where(col_mask[:, None, :], -jnp.inf, y)
    y = jnp.where(row_mask[:, :, None], -jnp.inf, y)
    return y


if __name__ == "__main__":
    B, Q, T, C = 2, 8, MAX_TOKEN_LEN, MAX_CLASSES

    captions = [
        "person . dog . wine glass .",
        "bear . zebra . giraffe . dining table .",
    ]

    # Deterministic synthetic logits; exercise the inf-handling paths.
    key = jax.random.PRNGKey(0)
    logits = jax.random.normal(key, (B, Q, T), dtype=jnp.float32)
    logits = logits.at[0, 3, :].set(-jnp.inf)     # entire row -> row_mask
    logits = logits.at[1, 5, 10].set(jnp.inf)     # isolated inf -> replaced by -20
    logits = logits.at[1, 2, 200].set(-jnp.inf)

    # Host-side map + presence-bias construction (string processing; not Pallas).
    maps_f32_np, col_bias_np = build_class_maps_and_bias(captions, T)
    class_maps = jnp.asarray(maps_f32_np, dtype=jnp.float32)      # f32 for parity
    col_bias = jnp.asarray(col_bias_np, dtype=jnp.float32)        # [B, 1, C]

    ref = jax.block_until_ready(reference_forward(logits, class_maps))
    ref_np = np.asarray(ref)
    finite = np.isfinite(ref_np)

    # ---- Path 1: f32 logits (strict parity with the f32 PyTorch module) ----
    out = jax.block_until_ready(
        caption_processor_forward(logits, class_maps, col_bias))
    assert out.shape == (B, Q, C)
    out_np = np.asarray(out)
    assert np.array_equal(np.isneginf(out_np), np.isneginf(ref_np)), \
        "Pallas -inf mask mismatch vs reference (f32 path)"
    assert np.allclose(out_np[finite], ref_np[finite], rtol=5e-3, atol=5e-3), \
        "Pallas output mismatch vs reference (f32 path)"

    # ---- Path 2: bf16 logits (halves the dominant HBM stream at large Q) ----
    out_bf16 = jax.block_until_ready(
        caption_processor_forward(logits.astype(jnp.bfloat16), class_maps, col_bias))
    out_bf16_np = np.asarray(out_bf16)
    assert np.array_equal(np.isneginf(out_bf16_np), np.isneginf(ref_np)), \
        "Pallas -inf mask mismatch vs reference (bf16-logits path)"
    assert np.allclose(out_bf16_np[finite], ref_np[finite], rtol=1e-2, atol=1e-2), \
        "Pallas output mismatch vs reference (bf16-logits path)"

    print("KERNEL_OK")
</pallas_src>

<mosaic_0001>
module attributes {stable_mosaic.version = 11 : i64} {
  func.func @caption_processor_kernel(%arg0: i32, %arg1: memref<2x8x256xf32, #tpu.memory_space<vmem>>, %arg2: memref<2x256x128xf32, #tpu.memory_space<vmem>>, %arg3: memref<2x1x128xf32, #tpu.memory_space<vmem>>, %arg4: memref<2x8x128xf32, #tpu.memory_space<vmem>>) attributes {dimension_semantics = [#tpu.dimension_semantics<arbitrary>], iteration_bounds = array<i64: 1>, scalar_prefetch = 0 : i64, scratch_operands = 0 : i64, tpu.core_type = #tpu.core_type<tc>, window_params = [{transform_indices = @transform_0, window_bounds = array<i64: 2, 8, 256>}, {transform_indices = @transform_1, window_bounds = array<i64: 2, 256, 128>}, {transform_indices = @transform_2, window_bounds = array<i64: 2, 1, 128>}, {transform_indices = @transform_3, window_bounds = array<i64: 2, 8, 128>}]} {
    %c0 = arith.constant 0 : index
    %c0_0 = arith.constant 0 : index
    %c0_1 = arith.constant 0 : index
    %0 = vector.load %arg1[%c0, %c0_0, %c0_1] : memref<2x8x256xf32, #tpu.memory_space<vmem>>, vector<2x8x256xf32>
    %c0_2 = arith.constant 0 : index
    %c0_3 = arith.constant 0 : index
    %c0_4 = arith.constant 0 : index
    %1 = vector.load %arg2[%c0_2, %c0_3, %c0_4] : memref<2x256x128xf32, #tpu.memory_space<vmem>>, vector<2x256x128xf32>
    %c0_5 = arith.constant 0 : index
    %c0_6 = arith.constant 0 : index
    %c0_7 = arith.constant 0 : index
    %2 = vector.load %arg3[%c0_5, %c0_6, %c0_7] : memref<2x1x128xf32, #tpu.memory_space<vmem>>, vector<2x1x128xf32>
    %3 = math.absf %0 : vector<2x8x256xf32>
    %cst = arith.constant 0x7F800000 : f32
    %4 = vector.broadcast %cst : f32 to vector<2x8x256xf32>
    %5 = arith.cmpf oeq, %3, %4 : vector<2x8x256xf32>
    %cst_8 = arith.constant 1.000000e+00 : f32
    %cst_9 = arith.constant 0.000000e+00 : f32
    %6 = vector.broadcast %cst_8 : f32 to vector<2x8x256xf32>
    %7 = vector.broadcast %cst_9 : f32 to vector<2x8x256xf32>
    %8 = arith.select %5, %6, %7 : vector<2x8x256xi1>, vector<2x8x256xf32>
    %cst_10 = arith.constant dense<0x7F800000> : vector<2x8xf32>
    %9 = vector.multi_reduction <minimumf>, %8, %cst_10 [2] : vector<2x8x256xf32> to vector<2x8xf32>
    %cst_11 = arith.constant 0.000000e+00 : f32
    %10 = vector.broadcast %cst_11 : f32 to vector<2x8xf32>
    %11 = arith.cmpf ogt, %9, %10 : vector<2x8xf32>
    %12 = vector.shape_cast %11 : vector<2x8xi1> to vector<2x8x1xi1>
    %cst_12 = arith.constant -2.000000e+01 : f32
    %13 = vector.broadcast %cst_12 : f32 to vector<2x8x256xf32>
    %14 = arith.select %5, %13, %0 : vector<2x8x256xi1>, vector<2x8x256xf32>
    "tpu.trace_start"() <{level = 10 : i32, message = "bqt,btc->bqc"}> : () -> ()
    %cst_13 = arith.constant dense<0.000000e+00> : vector<2x8x128xf32>
    %15 = tpu.matmul %14, %1, %cst_13 {dimension_numbers = #tpu.dot_dimension_numbers<[2], [1], [1], [2], [0, 0, 0, 1, 1, 2], [0], [0]>} : vector<2x8x256xf32>, vector<2x256x128xf32>, vector<2x8x128xf32> -> vector<2x8x128xf32>
    "tpu.trace_stop"() : () -> ()
    %16 = vector.broadcast %2 : vector<2x1x128xf32> to vector<2x8x128xf32>
    %17 = arith.addf %15, %16 : vector<2x8x128xf32>
    %cst_14 = arith.constant 0xFF800000 : f32
    %18 = vector.shape_cast %12 : vector<2x8x1xi1> to vector<2x8x1xi1>
    %19 = vector.broadcast %18 : vector<2x8x1xi1> to vector<2x8x128xi1>
    %20 = vector.broadcast %cst_14 : f32 to vector<2x8x128xf32>
    %21 = arith.select %19, %20, %17 : vector<2x8x128xi1>, vector<2x8x128xf32>
    %c0_15 = arith.constant 0 : index
    %c0_16 = arith.constant 0 : index
    %c0_17 = arith.constant 0 : index
    %22 = vector.load %arg4[%c0_15, %c0_16, %c0_17] : memref<2x8x128xf32, #tpu.memory_space<vmem>>, vector<2x8x128xf32>
    tpu.vector_store %arg4[%c0_15, %c0_16, %c0_17], %21 {strides = array<i32>} : memref<2x8x128xf32, #tpu.memory_space<vmem>>, vector<2x8x128xf32>,
    return
  }
  func.func @transform_0(%arg0: i32) -> (i32, i32, i32) {
    %c0_i32 = arith.constant 0 : i32
    %c0_i32_0 = arith.constant 0 : i32
    %c0_i32_1 = arith.constant 0 : i32
    return %arg0, %c0_i32, %c0_i32_0 : i32, i32, i32
  }
  func.func @transform_1(%arg0: i32) -> (i32, i32, i32) {
    %c0_i32 = arith.constant 0 : i32
    %c0_i32_0 = arith.constant 0 : i32
    %c0_i32_1 = arith.constant 0 : i32
    return %arg0, %c0_i32, %c0_i32_0 : i32, i32, i32
  }
  func.func @transform_2(%arg0: i32) -> (i32, i32, i32) {
    %c0_i32 = arith.constant 0 : i32
    %c0_i32_0 = arith.constant 0 : i32
    %c0_i32_1 = arith.constant 0 : i32
    return %arg0, %c0_i32, %c0_i32_0 : i32, i32, i32
  }
  func.func @transform_3(%arg0: i32) -> (i32, i32, i32) {
    %c0_i32 = arith.constant 0 : i32
    %c0_i32_0 = arith.constant 0 : i32
    %c0_i32_1 = arith.constant 0 : i32
    return %arg0, %c0_i32, %c0_i32_0 : i32, i32, i32
  }
}

</mosaic_0001>

<bundles_post_ra>
// kernel: tpu_custom_call.1
= control target key start
LH: loop header
LB: loop body
LE: loop exit
PB: predicated region body
PF: predicated region fallthrough
CT: control target
= control target key end

     0   :  { %8 = vsyncpa [#allocation3], 0  ;;  %s639_s0 = inlined_call_operand.hbm [shape: f32[2,8,256], index: 0, kind: input, shape index: {}]   ;;  %s640_s1 = inlined_call_operand.hbm [shape: f32[2,256,128], index: 1, kind: input, shape index: {}]   ;;  %s641_s2 = inlined_call_operand.vmem [shape: f32[2,1,128], index: 2, kind: input, shape index: {}]   ;;  %s642_s3 = inlined_call_operand.hbm [shape: f32[2,8,128], index: 3, kind: output, shape index: {}]  }
   0x1   :  { %9 = vsyncpa [#allocation6], 0 }
   0x2   :  { %10 = vsyncpa [#allocation4], 0  ;;  %s531_s12 = smov [#allocation2]   ;;  %s459_s16 = scalar_lea.hbm %s639_s0, 512 }
   0x3   :  { %s16_s13 = sshll.u32 %s531_s12, 4  ;;  %p460_p0 = scmp.ne.s32.totalorder %s639_s0, %s459_s16  ;;  %s17_s13 = int_to_ptr.vmem [resolvable:$true] %s16_s13 }
   0x4   :  { %p463_p1 = scmp.lt.u32.totalorder %s459_s16, %s639_s0 }
   0x6   :  { %p465_p2 = pnand %p463_p1, %p460_p0 }
   0x8   :  { %468 = shalt.err (!%p465_p2)
}
   0x9   :  { %s469_s21 = scalar_lea.vmem %s17_s13, 512  ;;  %p474_p4 = scmp.lt.s32.totalorder %s17_s13, %s17_s13 }
   0xa   :  { %p470_p3 = scmp.ne.s32.totalorder %s17_s13, %s469_s21  ;;  %p475_p5 = scmp.lt.s32.totalorder %s469_s21, %s469_s21 }
   0xc   :  { %p476_p6 = por %p475_p5, %p474_p4 }
   0xe   :  { %p477_p7 = pnand %p476_p6, %p470_p3 }
  0x10   :  { %480 = shalt.err (!%p477_p7)
}
  0x11   :  { %s532_s22 = smov 256   ;;  %s533_s23 = smov 16  }
  0x12   :  { %22 = dma.hbm_to_vmem [thread:$0]  %s639_s0, 512, %s17_s13, [#allocation3], %s532_s22, %s532_s22, %s533_s23  }
  0x13   :  { %s534_s26 = smov [#allocation5]   ;;  %s481_s30 = scalar_lea.hbm %s640_s1, 8192 }
  0x14   :  { %s28_s27 = sshll.u32 %s534_s26, 4  ;;  %p482_p8 = scmp.ne.s32.totalorder %s640_s1, %s481_s30  ;;  %s29_s27 = int_to_ptr.vmem [resolvable:$true] %s28_s27 }
  0x15   :  { %p485_p9 = scmp.lt.u32.totalorder %s481_s30, %s640_s1 }
  0x17   :  { %p487_p10 = pnand %p485_p9, %p482_p8 }
  0x19   :  { %490 = shalt.err (!%p487_p10)
}
  0x1a   :  { %s491_s8 = scalar_lea.vmem %s29_s27, 8192  ;;  %p496_p12 = scmp.lt.s32.totalorder %s29_s27, %s29_s27 }
  0x1b   :  { %p492_p11 = scmp.ne.s32.totalorder %s29_s27, %s491_s8  ;;  %p497_p13 = scmp.lt.s32.totalorder %s491_s8, %s491_s8 }
  0x1d   :  { %p498_p0 = por %p497_p13, %p496_p12 }
  0x1f   :  { %p499_p1 = pnand %p498_p0, %p492_p11 }
  0x21   :  { %502 = shalt.err (!%p499_p1)
}
  0x22   :  { %s535_s0 = smov 128   ;;  %s536_s9 = smov 8  }
  0x23   :  { %34 = dma.hbm_to_vmem [thread:$0]  %s640_s1, 8192, %s29_s27, [#allocation6], %s535_s0, %s535_s0, %s536_s9  }
  0x24   :  { %525 = dma.done.wait [#allocation3], 512  }
  0x25   :  { %526 = vsyncadd [#allocation3], 4294966784 }
  0x26   :  { %527 = dma.done.wait [#allocation6], 8192  }
  0x27   :  { %528 = vsyncadd [#allocation6], 4294959104  ;;  %v63_v0 = vld [vmem:[#allocation5 + $0x80] sm:$0xff]  ;;  %v64_v1 = vld [vmem:[#allocation5 + $0x88] sm:$0xff]  ;;  %s538_s15 = smov [#allocation7]  }
  0x28   :  { %v95_v2 = vld [vmem:[#allocation5 + $0x180] sm:$0xff]  ;;  %v387_v3 = vpack.c.bf16 %v64_v1, %v63_v0  ;;  %v96_v4 = vld [vmem:[#allocation5 + $0x188] sm:$0xff]  ;;  %v65_v11 = vld [vmem:[#allocation5 + $0x90] sm:$0xff]  ;;  %s302_s16 = sshll.u32 %s538_s15, 4  ;;  %s303_s16 = int_to_ptr.vmem [resolvable:$true] %s302_s16 }
  0x29   :  { %v47_v5 = vld [vmem:[#allocation5] sm:$0xff]  ;;  %v48_v6 = vld [vmem:[#allocation5 + $0x8] sm:$0xff]  ;;  %v419_v7 = vpack.c.bf16 %v96_v4, %v95_v2  ;;  %v66_v13 = vld [vmem:[#allocation5 + $0x98] sm:$0xff]  ;;  %s503_s17 = scalar_lea.vmem %s303_s16, 256  ;;  %p508_p3 = scmp.lt.s32.totalorder %s303_s16, %s303_s16 }
  0x2a   :  { %v389_v8 = vpack.c.bf16 %v48_v6, %v47_v5  ;;  %v79_v9 = vld [vmem:[#allocation5 + $0x100] sm:$0xff]  ;;  %v80_v10 = vld [vmem:[#allocation5 + $0x108] sm:$0xff]  ;;  %388 = vmatprep.subr.bf16.mxu0 %v387_v3  ;;  %v97_v14 = vld [vmem:[#allocation5 + $0x190] sm:$0xff]  ;;  %v391_v16 = vpack.c.bf16 %v66_v13, %v65_v11  ;;  %p504_p2 = scmp.ne.s32.totalorder %s303_s16, %s503_s17  ;;  %p509_p4 = scmp.lt.s32.totalorder %s503_s17, %s503_s17 }
  0x2b   :  { %v421_v12 = vpack.c.bf16 %v80_v10, %v79_v9  ;;  %v98_v15 = vld [vmem:[#allocation5 + $0x198] sm:$0xff]  ;;  %420 = vmatprep.subr.bf16.mxu1 %v419_v7  ;;  %v49_v18 = vld [vmem:[#allocation5 + $0x10] sm:$0xff]  ;;  %v67_v23 = vld [vmem:[#allocation5 + $0xa0] sm:$0xff] }
  0x2c   :  { %390 = vmatpush3.bf16.msra.mxu0 %v389_v8  ;;  %v423_v17 = vpack.c.bf16 %v98_v15, %v97_v14  ;;  %v50_v19 = vld [vmem:[#allocation5 + $0x18] sm:$0xff]  ;;  %v81_v20 = vld [vmem:[#allocation5 + $0x110] sm:$0xff]  ;;  %v68_v24 = vld [vmem:[#allocation5 + $0xa8] sm:$0xff]  ;;  %p510_p5 = por %p509_p4, %p508_p3 }
  0x2d   :  { %422 = vmatpush3.bf16.msra.mxu1 %v421_v12  ;;  %v393_v21 = vpack.c.bf16 %v50_v19, %v49_v18  ;;  %v82_v22 = vld [vmem:[#allocation5 + $0x118] sm:$0xff]  ;;  %392 = vmatprep.subr.bf16.mxu0 %v391_v16  ;;  %v395_v26 = vpack.c.bf16 %v68_v24, %v67_v23  ;;  %v99_v27 = vld [vmem:[#allocation5 + $0x1a0] sm:$0xff]  ;;  %v100_v28 = vld [vmem:[#allocation5 + $0x1a8] sm:$0xff] }
  0x2e   :  { %424 = vmatprep.subr.bf16.mxu1 %v423_v17  ;;  %v425_v25 = vpack.c.bf16 %v82_v22, %v81_v20  ;;  %v51_v29 = vld [vmem:[#allocation5 + $0x20] sm:$0xff]  ;;  %v427_v30 = vpack.c.bf16 %v100_v28, %v99_v27  ;;  %v52_v31 = vld [vmem:[#allocation5 + $0x28] sm:$0xff]  ;;  %v69_v35 = vld [vmem:[#allocation5 + $0xb0] sm:$0xff]  ;;  %p511_p6 = pnand %p510_p5, %p504_p2 }
  0x2f   :  { %v83_v32 = vld [vmem:[#allocation5 + $0x120] sm:$0xff]  ;;  %v84_v33 = vld [vmem:[#allocation5 + $0x128] sm:$0xff]  ;;  %v397_v34 = vpack.c.bf16 %v52_v31, %v51_v29  ;;  %v70_v36 = vld [vmem:[#allocation5 + $0xb8] sm:$0xff] }
  0x30   :  { %394 = vmatpush3.bf16.msra.mxu0 %v393_v21  ;;  %v101_v37 = vld [vmem:[#allocation5 + $0x1b0] sm:$0xff]  ;;  %v429_v38 = vpack.c.bf16 %v84_v33, %v83_v32  ;;  %v399_v39 = vpack.c.bf16 %v70_v36, %v69_v35  ;;  %v102_v40 = vld [vmem:[#allocation5 + $0x1b8] sm:$0xff]  ;;  %v71_v46 = vld [vmem:[#allocation5 + $0xc0] sm:$0xff] }
  0x31   :  { %426 = vmatpush3.bf16.msra.mxu1 %v425_v25  ;;  %396 = vmatprep.subr.bf16.mxu0 %v395_v26  ;;  %v53_v41 = vld [vmem:[#allocation5 + $0x30] sm:$0xff]  ;;  %v54_v42 = vld [vmem:[#allocation5 + $0x38] sm:$0xff]  ;;  %v431_v43 = vpack.c.bf16 %v102_v40, %v101_v37  ;;  %v72_v47 = vld [vmem:[#allocation5 + $0xc8] sm:$0xff] }
  0x32   :  { %428 = vmatprep.subr.bf16.mxu1 %v427_v30  ;;  %v85_v44 = vld [vmem:[#allocation5 + $0x130] sm:$0xff]  ;;  %v86_v45 = vld [vmem:[#allocation5 + $0x138] sm:$0xff]  ;;  %v103_v48 = vld [vmem:[#allocation5 + $0x1c0] sm:$0xff]  ;;  %v401_v50 = vpack.c.bf16 %v54_v42, %v53_v41  ;;  %v403_v52 = vpack.c.bf16 %v72_v47, %v71_v46 }
  0x33   :  { %v104_v49 = vld [vmem:[#allocation5 + $0x1c8] sm:$0xff]  ;;  %v433_v51 = vpack.c.bf16 %v86_v45, %v85_v44  ;;  %v55_v53 = vld [vmem:[#allocation5 + $0x40] sm:$0xff]  ;;  %v73_v58 = vld [vmem:[#allocation5 + $0xd0] sm:$0xff]  ;;  %v537_v44 = vmov 0.0  }
  0x34   :  { %398 = vmatpush3.bf16.msra.mxu0 %v397_v34  ;;  %v56_v54 = vld [vmem:[#allocation5 + $0x48] sm:$0xff]  ;;  %v87_v55 = vld [vmem:[#allocation5 + $0x140] sm:$0xff]  ;;  %v435_v56 = vpack.c.bf16 %v104_v49, %v103_v48  ;;  %v74_v59 = vld [vmem:[#allocation5 + $0xd8] sm:$0xff] }
  0x35   :  { %430 = vmatpush3.bf16.msra.mxu1 %v429_v38  ;;  %400 = vmatprep.subr.bf16.mxu0 %v399_v39  ;;  %v88_v57 = vld [vmem:[#allocation5 + $0x148] sm:$0xff]  ;;  %v105_v60 = vld [vmem:[#allocation5 + $0x1d0] sm:$0xff]  ;;  %v106_v61 = vld [vmem:[#allocation5 + $0x1d8] sm:$0xff]  ;;  %v405_v62 = vpack.c.bf16 %v56_v54, %v55_v53  ;;  %v407_v1 = vpack.c.bf16 %v74_v59, %v73_v58 }
  0x36   :  { %432 = vmatprep.subr.bf16.mxu1 %v431_v43  ;;  %v57_v63 = vld [vmem:[#allocation5 + $0x50] sm:$0xff]  ;;  %v437_v0 = vpack.c.bf16 %v88_v57, %v87_v55  ;;  %v58_v2 = vld [vmem:[#allocation5 + $0x58] sm:$0xff]  ;;  %v439_v5 = vpack.c.bf16 %v106_v61, %v105_v60  ;;  %v75_v6 = vld [vmem:[#allocation5 + $0xe0] sm:$0xff] }
  0x37   :  { %v89_v3 = vld [vmem:[#allocation5 + $0x150] sm:$0xff]  ;;  %v90_v4 = vld [vmem:[#allocation5 + $0x158] sm:$0xff]  ;;  %v76_v7 = vld [vmem:[#allocation5 + $0xe8] sm:$0xff]  ;;  %v409_v12 = vpack.c.bf16 %v58_v2, %v57_v63 }
  0x38   :  { %402 = vmatpush3.bf16.msra.mxu0 %v401_v50  ;;  %v107_v8 = vld [vmem:[#allocation5 + $0x1e0] sm:$0xff]  ;;  %v108_v9 = vld [vmem:[#allocation5 + $0x1e8] sm:$0xff]  ;;  %v77_v15 = vld [vmem:[#allocation5 + $0xf0] sm:$0xff]  ;;  %v441_v16 = vpack.c.bf16 %v90_v4, %v89_v3  ;;  %v411_v17 = vpack.c.bf16 %v76_v7, %v75_v6 }
  0x39   :  { %434 = vmatpush3.bf16.msra.mxu1 %v433_v51  ;;  %404 = vmatprep.subr.bf16.mxu0 %v403_v52  ;;  %v59_v10 = vld [vmem:[#allocation5 + $0x60] sm:$0xff]  ;;  %v60_v11 = vld [vmem:[#allocation5 + $0x68] sm:$0xff]  ;;  %v78_v18 = vld [vmem:[#allocation5 + $0xf8] sm:$0xff]  ;;  %v443_v21 = vpack.c.bf16 %v108_v9, %v107_v8 }
  0x3a   :  { %436 = vmatprep.subr.bf16.mxu1 %v435_v56  ;;  %v91_v13 = vld [vmem:[#allocation5 + $0x160] sm:$0xff]  ;;  %v92_v14 = vld [vmem:[#allocation5 + $0x168] sm:$0xff]  ;;  %v46_v20 = vld [vmem:[#allocation2 + $0x18] sm:$0xff]  ;;  %v413_v30 = vpack.c.bf16 %v60_v11, %v59_v10  ;;  %v415_v34 = vpack.c.bf16 %v78_v18, %v77_v15 }
  0x3b   :  { %v44_v19 = vld [vmem:[#allocation2 + $0x8] sm:$0xff]  ;;  %v116_v23 = vand.u32 2147483647, %v46_v20  ;;  %v43_v24 = vld [vmem:[#allocation2] sm:$0xff]  ;;  %v45_v25 = vld [vmem:[#allocation2 + $0x10] sm:$0xff]  ;;  %v445_v31 = vpack.c.bf16 %v92_v14, %v91_v13 }
  0x3c   :  { %406 = vmatpush3.bf16.msra.mxu0 %v405_v62  ;;  %v114_v22 = vand.u32 2147483647, %v44_v19  ;;  %v109_v26 = vld [vmem:[#allocation5 + $0x1f0] sm:$0xff]  ;;  %v110_v27 = vld [vmem:[#allocation5 + $0x1f8] sm:$0xff]  ;;  %v113_v28 = vand.u32 2147483647, %v43_v24 }
  0x3d   :  { %438 = vmatpush3.bf16.msra.mxu1 %v437_v0  ;;  %408 = vmatprep.subr.bf16.mxu0 %v407_v1  ;;  %v115_v29 = vand.u32 2147483647, %v45_v25  ;;  %vm590_vm1 = vcmp.eq.f32.partialorder %v116_v23, inf  ;;  %v61_v35 = vld [vmem:[#allocation5 + $0x70] sm:$0xff]  ;;  %v62_v36 = vld [vmem:[#allocation5 + $0x78] sm:$0xff]  ;;  %v447_v40 = vpack.c.bf16 %v110_v27, %v109_v26 }
  0x3e   :  { %440 = vmatprep.subr.bf16.mxu1 %v439_v5  ;;  %vm586_vm0 = vcmp.eq.f32.partialorder %v114_v22, inf  ;;  %v136_v38 = vsel %vm590_vm1, -20.0, %v46_v20  ;;  %vm598_vm2 = vcmp.eq.f32.partialorder %v113_v28, inf  ;;  %v93_v41 = vld [vmem:[#allocation5 + $0x170] sm:$0xff]  ;;  %v94_v42 = vld [vmem:[#allocation5 + $0x178] sm:$0xff]  ;;  %v124_v47 = vsel %vm590_vm1, 1.0, %v537_v44 }
  0x3f   :  { %v134_v37 = vsel %vm586_vm0, -20.0, %v44_v19  ;;  %vm602_vm3 = vcmp.eq.f32.partialorder %v115_v29, inf  ;;  %v121_v45 = vsel %vm598_vm2, 1.0, %v537_v44  ;;  %v122_v46 = vsel %vm586_vm0, 1.0, %v537_v44  ;;  %283 = vmatprep.mubr.f32.mxu1 %v136_v38  ;;  %v315_v59 = vld [vmem:[%s641_s2] ss:$0 sm:$0xff] }
  0x40   :  { %410 = vmatpush3.bf16.msra.mxu0 %v409_v12  ;;  %213 = vmatprep.mubr.f32.mxu0 %v134_v37  ;;  %v125_v48 = vmin.f32 %v121_v45, %v122_v46  ;;  %v123_v49 = vsel %vm602_vm3, 1.0, %v537_v44  ;;  %v417_v50 = vpack.c.bf16 %v62_v36, %v61_v35  ;;  %v449_v51 = vpack.c.bf16 %v94_v42, %v93_v41  ;;  %v316_v62 = vld [vmem:[%s641_s2 + $0x1] ss:$0 sm:$0xff] }
  0x41   :  { %442 = vmatpush3.bf16.msra.mxu1 %v441_v16  ;;  %412 = vmatprep.subr.bf16.mxu0 %v411_v17  ;;  %v128_v52 = vmin.f32 %v123_v49, %v124_v47  ;;  %v133_v53 = vsel %vm598_vm2, -20.0, %v43_v24  ;;  %v135_v54 = vsel %vm602_vm3, -20.0, %v45_v25 }
  0x42   :  { %444 = vmatprep.subr.bf16.mxu1 %v443_v21  ;;  %126 = vmin.xlane.f32.xlu0 %v125_v48 }
  0x44   :  { %414 = vmatpush3.bf16.msra.mxu0 %v413_v30 }
  0x45   :  { %446 = vmatpush3.bf16.msra.mxu1 %v445_v31  ;;  %416 = vmatprep.subr.bf16.mxu0 %v415_v34 }
  0x46   :  { %448 = vmatprep.subr.bf16.mxu1 %v447_v40  ;;  %129 = vmin.xlane.f32.xlu0 %v128_v52 }
  0x48   :  { %418 = vmatpush3.bf16.msra.mxu0 %v417_v50 }
  0x49   :  { %450 = vmatpush3.bf16.msra.mxu1 %v449_v51 }
  0x4b   :  { %214 = vmatmul.mubr.f32.vlgmr.msra.gmra.mrb[0].mxu0 %v133_v53 }
  0x4c   :  { %284 = vmatmul.mubr.f32.vlgmr.msra.gmra.mrb[0].mxu1 %v135_v54 }
  0xcf   :  { %v127_v55 = vpop.xlane.xlu0 %126 }
  0xd0   :  { %vm131_vm5 = vcmp.gt.f32.partialorder %v127_v55, 0.0 }
  0xd3   :  { %v130_v57 = vpop.xlane.xlu0 %129 }
  0xd4   :  { %vm132_vm4 = vcmp.gt.f32.partialorder %v130_v57, 0.0 }
 0x11e   :  { %v349_v56 = vpop.f32.mrb[0].mxu0 }
 0x11f   :  { %v384_v58 = vpop.f32.mrb[0].mxu1  ;;  %v350_v60 = vpop.f32.mrb[1].mxu0 }
 0x120   :  { %v351_v61 = vadd.f32 %v350_v60, %v349_v56  ;;  %v385_v63 = vpop.f32.mrb[1].mxu1 }
 0x121   :  { %v386_v0 = vadd.f32 %v385_v63, %v384_v58 }
 0x122   :  { %v216_v1 = vadd.f32 %v351_v61, %v315_v59 }
 0x123   :  { %v286_v2 = vadd.f32 %v386_v0, %v316_v62 }
 0x124   :  { %v293_v3 = vsel %vm131_vm5, -inf, %v216_v1 }
 0x125   :  { %v294_v4 = vsel %vm132_vm4, -inf, %v286_v2  ;;  %295 = vst [vmem:[#allocation7] sm:$0xff] %v293_v3 }
 0x126   :  { %296 = vst [vmem:[#allocation7 + $0x8] sm:$0xff] %v294_v4 }
 0x127   :  { %514 = shalt.err (!%p511_p6)
}
 0x128   :  { %s515_s19 = scalar_lea.hbm %s642_s3, 256 }
 0x129   :  { %p516_p7 = scmp.ne.s32.totalorder %s642_s3, %s515_s19  ;;  %p519_p8 = scmp.lt.u32.totalorder %s515_s19, %s642_s3 }
 0x12b   :  { %p521_p9 = pnand %p519_p8, %p516_p7 }
 0x12d   :  { %524 = shalt.err (!%p521_p9)
}
 0x12e   :  { %308 = dma.vmem_to_hbm [thread:$0]  %s303_s16, 256, %s642_s3, [#allocation4], %s535_s0, %s535_s0, %s536_s9  }
 0x12f   :  { %529 = dma.done.wait [#allocation4], 256  }
 0x130   :  { %530 = vsyncadd [#allocation4], 4294967040 }
 0x131   :  { %312 = vsyncpa [#allocation3], 1 }
 0x132   :  { %313 = vsyncpa [#allocation6], 1 }
 0x133   :  { %314 = vsyncpa [#allocation4], 1 }

</bundles_post_ra>
